<compile_context>
chip_gen: v6e
topology: v6e:2x2x1
jax: 0.10.0
libtpu: 0.0.40
codegen_flags: <defaults>
</compile_context>

<pallas_src>
import math
import jax
import jax.numpy as jnp
from jax.experimental import pallas as pl
from jax.experimental.pallas import tpu as pltpu


# ----------------------------------------------------------------------------
# Host-side construction of the interpolation / wavelet matrices (tiny, once).
# ----------------------------------------------------------------------------
def _interp_matrix(out_size, in_size):
    """PyTorch bilinear (align_corners=False) interpolation matrix (out, in)."""
    i = jnp.arange(out_size, dtype=jnp.float32)
    src = (i + 0.5) * (in_size / out_size) - 0.5
    src = jnp.maximum(src, 0.0)                      # PyTorch clamps negative src to 0
    i0f = jnp.floor(src)
    lam = src - i0f
    i0 = jnp.clip(i0f.astype(jnp.int32), 0, in_size - 1)
    i1 = jnp.clip(i0 + 1, 0, in_size - 1)
    oh0 = jax.nn.one_hot(i0, in_size, dtype=jnp.float32)
    oh1 = jax.nn.one_hot(i1, in_size, dtype=jnp.float32)
    return (1.0 - lam)[:, None] * oh0 + lam[:, None] * oh1


# ----------------------------------------------------------------------------
# Kernel A: fused bilinear upsample + Haar-HH |detail|, both as MXU matmuls
# with lane-dense (flattened-spatial) outputs.
# ----------------------------------------------------------------------------
def upsample_hh_pallas(x, scale):
    N, C, Hin, Win = x.shape
    Hout, Wout = Hin * scale, Win * scale
    H2, W2 = Hout // 2, Wout // 2

    wh = _interp_matrix(Hout, Hin)                    # (Hout, Hin)
    ww = _interp_matrix(Wout, Win)                    # (Wout, Win)
    # upsample operator on flattened spatial: up_flat = x_flat @ kron(wh, ww)^T
    kup = jnp.kron(wh, ww).T                          # (Hin*Win, Hout*Wout)
    # Haar HH diagonal detail folded into the same linear operator:
    # HH = 0.5*(up[2h,2w] - up[2h,2w+1] - up[2h+1,2w] + up[2h+1,2w+1])
    # TODO(synk): Wmad_estimator uses a db7 wavelet; Haar HH is a stand-in.
    dh = wh[0::2] - wh[1::2]                          # (H2, Hin)
    dw = ww[0::2] - ww[1::2]                          # (W2, Win)
    khh = 0.5 * jnp.kron(dh, dw).T                    # (Hin*Win, H2*W2)

    x_flat = x.reshape(N, C, Hin * Win).astype(jnp.float32)

    def kernel(x_ref, kup_ref, khh_ref, up_ref, hh_ref):
        xv = x_ref[0]                                 # (C, Hin*Win)
        up_ref[0] = jnp.dot(xv, kup_ref[...], preferred_element_type=jnp.float32)
        hh = jnp.dot(xv, khh_ref[...], preferred_element_type=jnp.float32)
        hh_ref[0] = jnp.abs(hh)

    return pl.pallas_call(
        kernel,
        out_shape=(jax.ShapeDtypeStruct((N, C, Hout * Wout), jnp.float32),
                   jax.ShapeDtypeStruct((N, C, H2 * W2), jnp.float32)),
        grid=(N,),
        in_specs=[
            pl.BlockSpec((1, C, Hin * Win), lambda n: (n, 0, 0)),
            pl.BlockSpec((Hin * Win, Hout * Wout), lambda n: (0, 0)),
            pl.BlockSpec((Hin * Win, H2 * W2), lambda n: (0, 0)),
        ],
        out_specs=(
            pl.BlockSpec((1, C, Hout * Wout), lambda n: (n, 0, 0)),
            pl.BlockSpec((1, C, H2 * W2), lambda n: (n, 0, 0)),
        ),
        compiler_params=pltpu.CompilerParams(
            dimension_semantics=("parallel",),
            vmem_limit_bytes=32 * 1024 * 1024),
    )(x_flat, kup, khh)


# ----------------------------------------------------------------------------
# Kernel B: synthetic "model" (stand-in for the external ResDNet) + residual
# subtract + Hardtanh(0, 255), fully fused.  Two Conv2d(3x3, padding=1) layers
# with hidden ReLU; residual scaled by exp(alpha) * sigma / 255.
# Padding is done in-kernel into VMEM scratch; shifted slabs are hoisted and
# reused across all filters.
# ----------------------------------------------------------------------------
def resdnet_residual_pallas(x_up, sigma, alpha_exp, w1, b1, w2, b2):
    N, C, H, W = x_up.shape
    F_ = w1.shape[0]
    w1f = w1.reshape(-1).astype(jnp.float32)          # (F*C*9,)
    w2f = w2.reshape(-1).astype(jnp.float32)          # (C*F*9,)

    def kernel(sig_ref, alp_ref, w1_ref, b1_ref, w2_ref, b2_ref,
               x_ref, o_ref, xpad_ref, hpad_ref):
        n = pl.program_id(0)
        gain = sig_ref[n] * alp_ref[0] * (1.0 / 255.0)

        # --- zero-pad input in VMEM (Conv2d padding=1 semantics) ---
        xpad_ref[...] = jnp.zeros_like(xpad_ref)
        for c in range(C):
            xpad_ref[c, 1:H + 1, 1:W + 1] = x_ref[0, c]

        # --- conv1 (C -> F_), padding=1, ReLU ---
        # slabs hoisted: each (c, ky, kx) shifted view loaded once, reused for all F_ filters
        acc1 = [jnp.full((H, W), b1_ref[f], dtype=jnp.float32) for f in range(F_)]
        for c in range(C):
            for ky in range(3):
                for kx in range(3):
                    slab = xpad_ref[c, ky:ky + H, kx:kx + W]
                    for f in range(F_):
                        acc1[f] = acc1[f] + w1_ref[(f * C + c) * 9 + ky * 3 + kx] * slab

        # --- zero-pad hidden (true Conv2d padding=1 for conv2) + ReLU ---
        hpad_ref[...] = jnp.zeros_like(hpad_ref)
        for f in range(F_):
            hpad_ref[f, 1:H + 1, 1:W + 1] = jnp.maximum(acc1[f], 0.0)

        # --- conv2 (F_ -> C), padding=1; residual subtract + Hardtanh(0,255) ---
        acc2 = [jnp.full((H, W), b2_ref[o], dtype=jnp.float32) for o in range(C)]
        for f in range(F_):
            for ky in range(3):
                for kx in range(3):
                    slab = hpad_ref[f, ky:ky + H, kx:kx + W]
                    for o in range(C):
                        acc2[o] = acc2[o] + w2_ref[(o * F_ + f) * 9 + ky * 3 + kx] * slab

        for o in range(C):
            res = acc2[o] * gain
            o_ref[0, o] = jnp.clip(x_ref[0, o] - res, 0.0, 255.0).astype(o_ref.dtype)

    smem = pl.BlockSpec(memory_space=pltpu.MemorySpace.SMEM)
    return pl.pallas_call(
        kernel,
        out_shape=jax.ShapeDtypeStruct((N, C, H, W), jnp.float32),
        grid=(N,),
        in_specs=[smem, smem, smem, smem, smem, smem,
                  pl.BlockSpec((1, C, H, W), lambda n: (n, 0, 0, 0))],
        out_specs=pl.BlockSpec((1, C, H, W), lambda n: (n, 0, 0, 0)),
        scratch_shapes=[pltpu.VMEM((C, H + 2, W + 2), jnp.float32),
                        pltpu.VMEM((F_, H + 2, W + 2), jnp.float32)],
        compiler_params=pltpu.CompilerParams(
            dimension_semantics=("parallel",),
            vmem_limit_bytes=32 * 1024 * 1024),
    )(sigma.astype(jnp.float32), alpha_exp.astype(jnp.float32),
      w1f, b1.astype(jnp.float32), w2f, b2.astype(jnp.float32),
      x_up.astype(jnp.float32))


# ----------------------------------------------------------------------------
# Full SRResDNet forward
# ----------------------------------------------------------------------------
def srresdnet_forward(x, scale, alpha, w1, b1, w2, b2):
    N, C, Hin, Win = x.shape
    Hout, Wout = Hin * scale, Win * scale

    # 1) bilinear upsample + 2) wavelet HH |detail| in ONE fused Pallas call
    x_up_flat, hh_abs = upsample_hh_pallas(x, scale)          # (N,C,Ho*Wo), (N,C,H2*W2)
    x_up = x_up_flat.reshape(N, C, Hout, Wout)                # free metadata reshape

    # Wmad-style sigma: normalize if dynamic range > 1, MAD of HH detail
    norm = jnp.where(jnp.max(x_up_flat) > 1.0, 1.0 / 255.0, 1.0)
    L = hh_abs.shape[-1]
    # TODO(synk): median (sort-based) has no clean Pallas equivalent; kept in plain JAX.
    med = jnp.sort(hh_abs, axis=-1)[..., (L - 1) // 2]        # torch.median (lower middle)
    sigma = jnp.mean(med * norm / 0.6745, axis=1)             # (N,)
    sigma = sigma * 255.0                                     # sigma *= 255.0

    # 3) model(input, sigma, alpha) -> residual; 4) input - output; 5) Hardtanh(0,255)
    # TODO(synk): self.model is an external ResDNet passed to __init__; a
    # deterministic 2-layer residual CNN stand-in (conditioned on sigma, exp(alpha)) is used.
    alpha_exp = jnp.exp(alpha)                                # (1,)
    return resdnet_residual_pallas(x_up, sigma, alpha_exp, w1, b1, w2, b2)


if __name__ == "__main__":
    key = jax.random.PRNGKey(0)
    k_x, k_w1, k_b1, k_w2, k_b2 = jax.random.split(key, 5)

    # small shapes: batch=2, channels=3, spatial 8x8, upscale=2 -> 16x16 output
    N, C, Hin, Win, SCALE, FEAT = 2, 3, 8, 8, 2, 8
    x = jax.random.uniform(k_x, (N, C, Hin, Win), dtype=jnp.float32)

    # deterministic synthetic parameters (shapes implied by the stand-in model)
    alpha = jnp.full((1,), math.log(2.0), dtype=jnp.float32)  # nn.Parameter(linspace(log2, log1, 1))
    w1 = 0.05 * jax.random.normal(k_w1, (FEAT, C, 3, 3), dtype=jnp.float32)
    b1 = 0.01 * jax.random.normal(k_b1, (FEAT,), dtype=jnp.float32)
    w2 = 0.05 * jax.random.normal(k_w2, (C, FEAT, 3, 3), dtype=jnp.float32)
    b2 = 0.01 * jax.random.normal(k_b2, (C,), dtype=jnp.float32)

    out = srresdnet_forward(x, SCALE, alpha, w1, b1, w2, b2)
    out = jax.block_until_ready(out)

    assert out.shape == (N, C, Hin * SCALE, Win * SCALE)
    assert out.dtype == jnp.float32
    assert bool(jnp.all(out >= 0.0)) and bool(jnp.all(out <= 255.0))
    print("KERNEL_OK")
</pallas_src>

<mosaic_0001>
module attributes {stable_mosaic.version = 11 : i64} {
  func.func @kernel(%arg0: i32, %arg1: memref<1x3x64xf32, #tpu.memory_space<vmem>>, %arg2: memref<64x256xf32, #tpu.memory_space<vmem>>, %arg3: memref<64x64xf32, #tpu.memory_space<vmem>>, %arg4: memref<1x3x256xf32, #tpu.memory_space<vmem>>, %arg5: memref<1x3x64xf32, #tpu.memory_space<vmem>>) attributes {dimension_semantics = [#tpu.dimension_semantics<parallel>], iteration_bounds = array<i64: 2>, scalar_prefetch = 0 : i64, scratch_operands = 0 : i64, tpu.core_type = #tpu.core_type<tc>, window_params = [{transform_indices = @transform_0, window_bounds = array<i64: 1, 3, 64>}, {pipeline_mode = #tpu.pipeline_mode<synchronous>, transform_indices = @transform_1, window_bounds = array<i64: 64, 256>}, {pipeline_mode = #tpu.pipeline_mode<synchronous>, transform_indices = @transform_2, window_bounds = array<i64: 64, 64>}, {transform_indices = @transform_3, window_bounds = array<i64: 1, 3, 256>}, {transform_indices = @transform_4, window_bounds = array<i64: 1, 3, 64>}]} {
    %c0 = arith.constant 0 : index
    %c0_0 = arith.constant 0 : index
    %c0_1 = arith.constant 0 : index
    %0 = vector.load %arg1[%c0, %c0_0, %c0_1] : memref<1x3x64xf32, #tpu.memory_space<vmem>>, vector<1x3x64xf32>
    %1 = vector.shape_cast %0 : vector<1x3x64xf32> to vector<3x64xf32>
    %c0_2 = arith.constant 0 : index
    %c0_3 = arith.constant 0 : index
    %2 = vector.load %arg2[%c0_2, %c0_3] : memref<64x256xf32, #tpu.memory_space<vmem>>, vector<64x256xf32>
    %cst = arith.constant dense<0.000000e+00> : vector<3x256xf32>
    %3 = tpu.matmul %1, %2, %cst {dimension_numbers = #tpu.dot_dimension_numbers<[1], [0], [0], [1], [0, 0, 1, 1], [], []>} : vector<3x64xf32>, vector<64x256xf32>, vector<3x256xf32> -> vector<3x256xf32>
    %c0_4 = arith.constant 0 : index
    %c0_5 = arith.constant 0 : index
    %c0_6 = arith.constant 0 : index
    %4 = vector.load %arg4[%c0_4, %c0_5, %c0_6] : memref<1x3x256xf32, #tpu.memory_space<vmem>>, vector<1x3x256xf32>
    %5 = vector.shape_cast %4 : vector<1x3x256xf32> to vector<3x256xf32>
    %6 = vector.shape_cast %3 : vector<3x256xf32> to vector<1x3x256xf32>
    tpu.vector_store %arg4[%c0_4, %c0_5, %c0_6], %6 {strides = array<i32>} : memref<1x3x256xf32, #tpu.memory_space<vmem>>, vector<1x3x256xf32>,
    %c0_7 = arith.constant 0 : index
    %c0_8 = arith.constant 0 : index
    %7 = vector.load %arg3[%c0_7, %c0_8] : memref<64x64xf32, #tpu.memory_space<vmem>>, vector<64x64xf32>
    %cst_9 = arith.constant dense<0.000000e+00> : vector<3x64xf32>
    %8 = tpu.matmul %1, %7, %cst_9 {dimension_numbers = #tpu.dot_dimension_numbers<[1], [0], [0], [1], [0, 0, 1, 1], [], []>} : vector<3x64xf32>, vector<64x64xf32>, vector<3x64xf32> -> vector<3x64xf32>
    %9 = math.absf %8 : vector<3x64xf32>
    %c0_10 = arith.constant 0 : index
    %c0_11 = arith.constant 0 : index
    %c0_12 = arith.constant 0 : index
    %10 = vector.load %arg5[%c0_10, %c0_11, %c0_12] : memref<1x3x64xf32, #tpu.memory_space<vmem>>, vector<1x3x64xf32>
    %11 = vector.shape_cast %10 : vector<1x3x64xf32> to vector<3x64xf32>
    %12 = vector.shape_cast %9 : vector<3x64xf32> to vector<1x3x64xf32>
    tpu.vector_store %arg5[%c0_10, %c0_11, %c0_12], %12 {strides = array<i32>} : memref<1x3x64xf32, #tpu.memory_space<vmem>>, vector<1x3x64xf32>,
    return
  }
  func.func @transform_0(%arg0: i32) -> (i32, i32, i32) {
    %c0_i32 = arith.constant 0 : i32
    %c0_i32_0 = arith.constant 0 : i32
    %c0_i32_1 = arith.constant 0 : i32
    return %arg0, %c0_i32, %c0_i32_0 : i32, i32, i32
  }
  func.func @transform_1(%arg0: i32) -> (i32, i32) {
    %c0_i32 = arith.constant 0 : i32
    %c0_i32_0 = arith.constant 0 : i32
    %c0_i32_1 = arith.constant 0 : i32
    return %c0_i32, %c0_i32_0 : i32, i32
  }
  func.func @transform_2(%arg0: i32) -> (i32, i32) {
    %c0_i32 = arith.constant 0 : i32
    %c0_i32_0 = arith.constant 0 : i32
    %c0_i32_1 = arith.constant 0 : i32
    return %c0_i32, %c0_i32_0 : i32, i32
  }
  func.func @transform_3(%arg0: i32) -> (i32, i32, i32) {
    %c0_i32 = arith.constant 0 : i32
    %c0_i32_0 = arith.constant 0 : i32
    %c0_i32_1 = arith.constant 0 : i32
    return %arg0, %c0_i32, %c0_i32_0 : i32, i32, i32
  }
  func.func @transform_4(%arg0: i32) -> (i32, i32, i32) {
    %c0_i32 = arith.constant 0 : i32
    %c0_i32_0 = arith.constant 0 : i32
    %c0_i32_1 = arith.constant 0 : i32
    return %arg0, %c0_i32, %c0_i32_0 : i32, i32, i32
  }
}

</mosaic_0001>

<bundles_post_ra>
// kernel: tpu_custom_call.1
= control target key start
LH: loop header
LB: loop body
LE: loop exit
PB: predicated region body
PF: predicated region fallthrough
CT: control target
= control target key end

     0   :  { %10 = vsyncpa [#allocation3], 0  ;;  %s779_s0 = inlined_call_operand.vmem [shape: f32[2,3,64], index: 0, kind: input, shape index: {}]   ;;  %s780_s1 = inlined_call_operand.hbm [shape: f32[64,256], index: 1, kind: input, shape index: {}]   ;;  %s781_s2 = inlined_call_operand.hbm [shape: f32[64,64], index: 2, kind: input, shape index: {}]   ;;  %s782_s3 = inlined_call_operand.vmem [shape: f32[2,3,256], index: 3, kind: output, shape index: {0}]   ;;  %s783_s4 = inlined_call_operand.vmem [shape: f32[2,3,64], index: 4, kind: output, shape index: {1}]  }
   0x1   :  { %11 = vsyncpa [#allocation5], 0  ;;  %s704_s15 = smov 0  }
   0x2 LB: > { %s671_s16 = smov [#allocation2]   ;;  %s710_s18 = sadd.s32 4294967295, %s669_s15   ;;  %s669_s15 = sphi %s704_s15, %s17_s15  }
   0x3   : > { %s154_s17 = sshll.u32 %s671_s16, 4  ;;  %p524_p0 = scmp.ge.s32.totalorder %s669_s15, 1  ;;  %s155_s17 = int_to_ptr.vmem [resolvable:$true] %s154_s17 }
   0x4   : > { %p142_p1 = scmp.lt.s32.totalorder %s669_s15, 3  ;;  %p583_p3 = scmp.eq.s32.totalorder %s710_s18, 0 }
   0x5   : > { %s672_s20 = smov [#allocation4]   ;;  %s614_s23 = scalar_lea.vmem %s155_s17, 2048 }
   0x6   : > { %p714_p2 = pnand %p524_p0, %p142_p1  ;;  %s167_s21 = sshll.u32 %s672_s20, 4  ;;  %s168_s21 = int_to_ptr.vmem [resolvable:$true] %s167_s21 }
   0x7   : > { %p615_p7 = scmp.ne.s32.totalorder %s155_s17, %s614_s23  ;;  %p622_p10 = scmp.lt.s32.totalorder %s155_s17, %s155_s17 }
   0x8   : > { %p576_p4 = pneg %p714_p2  ;;  %p623_p11 = scmp.lt.s32.totalorder %s614_s23, %s614_s23 }
   0xa   : > { %p723_p5 = pnand %p583_p3, %p576_p4  ;;  %p624_p12 = por %p623_p11, %p622_p10 }
   0xc   : > { %p605_p6 = pneg %p723_p5 }
   0xe   : > { %p617_p8 = pnand %p615_p7, %p605_p6 }
  0x10   : > { %p618_p9 = pneg %p617_p8 }
  0x12   : > { %p625_p13 = pnand %p624_p12, %p618_p9 }
  0x14   : > { %628 = shalt.err (!%p625_p13)
}
  0x15   : > { %s673_s24 = smov 256   ;;  %s674_s25 = smov 16  }
  0x16   : > { %579 = dma.hbm_to_vmem [thread:$0]  (!%p723_p5), %s780_s1, 2048, %s155_s17, [#allocation3], %s673_s24, %s673_s24, %s674_s25  }
  0x17   : > { %s640_s28 = scalar_lea.vmem %s168_s21, 1024  ;;  %p648_p7 = scmp.lt.s32.totalorder %s168_s21, %s168_s21 }
  0x18   : > { %p641_p0 = scmp.ne.s32.totalorder %s168_s21, %s640_s28  ;;  %p649_p8 = scmp.lt.s32.totalorder %s640_s28, %s640_s28 }
  0x1a   : > { %p643_p1 = pnand %p641_p0, %p605_p6  ;;  %p650_p10 = por %p649_p8, %p648_p7 }
  0x1c   : > { %p644_p4 = pneg %p643_p1 }
  0x1e   : > { %p651_p9 = pnand %p650_p10, %p644_p4 }
  0x20   : > { %654 = shalt.err (!%p651_p9)
}
  0x21   : > { %s675_s29 = smov 128   ;;  %s676_s30 = smov 8  }
  0x22   : > { %582 = dma.hbm_to_vmem [thread:$0]  (!%p723_p5), %s781_s2, 1024, %s168_s21, [#allocation5], %s675_s29, %s675_s29, %s676_s30  }
  0x23   : > { %190 = sbr.rel (%p714_p2) target bundleno = 259 (0x103), region = 32 }
  0x28   : > { %660 = dma.done.wait (%p583_p3), [#allocation3], 2048  }
  0x29   : > { %662 = vsyncadd (%p583_p3), [#allocation3], 4294965248 }
  0x2a   : > { %664 = dma.done.wait (%p583_p3), [#allocation5], 1024  }
  0x2b   : > { %666 = vsyncadd (%p583_p3), [#allocation5], 4294966272  ;;  %v677_v0 = vmov 0.0   ;;  %vm678_vm0 = vmmov 0   ;;  %p223_p5 = scmp.lt.s32.totalorder %s710_s18, 1  ;;  %v252_v1 = vld [vmem:[#allocation2 + $0x78] sm:$0xff] }
  0x2c   : > { %549 = vmatprep.subr.mxu1 %v677_v0  ;;  %321 = vmatprep.mubr.f32.mxu0 %v677_v0  ;;  %v251_v2 = vld [vmem:[#allocation2 + $0x70] sm:$0xff]  ;;  %v340_v3 = vld [vmem:[#allocation4 + $0x38] sm:$0xff]  ;;  %v250_v4 = vld [vmem:[#allocation2 + $0x68] sm:$0xff]  ;;  %vm253_vm1 = vcmask 523264   ;;  %vm412_vm2 = vcmask 518144  }
  0x2d   : > { %565 = vmatprep.mubr.msk.f32.mxu1 %vm678_vm0, %v677_v0  ;;  %273 = vmatprep.subr.mxu0 %v252_v1  ;;  %v249_v5 = vld [vmem:[#allocation2 + $0x60] sm:$0xff]  ;;  %v339_v6 = vld [vmem:[#allocation4 + $0x30] sm:$0xff]  ;;  %v248_v7 = vld [vmem:[#allocation2 + $0x58] sm:$0xff]  ;;  %s787_s18 = smov (!%p223_p5, %s710_s18), 1 }
  0x2e   : > { %550 = vmatpush3.msra.mxu1 %v340_v3  ;;  %274 = vmatpush1.msra.mxu0 %v251_v2  ;;  %v338_v8 = vld [vmem:[#allocation4 + $0x28] sm:$0xff]  ;;  %v247_v9 = vld [vmem:[#allocation2 + $0x50] sm:$0xff]  ;;  %v337_v11 = vld [vmem:[#allocation4 + $0x20] sm:$0xff]  ;;  %s531_s7 = sshll.u32 %s787_s18, 2  ;;  %s539_s14 = sshll.u32 %s787_s18, 3 }
  0x2f   : > { %551 = vmatprep.subr.mxu1 %v677_v0  ;;  %275 = vmatprep.subr.mxu0 %v250_v4  ;;  %v246_v10 = vld [vmem:[#allocation2 + $0x48] sm:$0xff]  ;;  %v245_v12 = vld [vmem:[#allocation2 + $0x40] sm:$0xff]  ;;  %v244_v13 = vld [vmem:[#allocation2 + $0x38] sm:$0xff]  ;;  %s226_s10 = scalar_lea.vmem %s779_s0, %s531_s7  ;;  %s235_s13 = scalar_lea.vmem %s783_s4, %s531_s7 }
  0x30   : > { %552 = vmatpush3.msra.mxu1 %v339_v6  ;;  %276 = vmatpush1.msra.mxu0 %v249_v5  ;;  %v336_v14 = vld [vmem:[#allocation4 + $0x18] sm:$0xff]  ;;  %v243_v15 = vld [vmem:[#allocation2 + $0x30] sm:$0xff]  ;;  %v242_v16 = vld [vmem:[#allocation2 + $0x28] sm:$0xff]  ;;  %s231_s19 = scalar_lea.vmem %s782_s3, %s539_s14 }
  0x31   : > { %553 = vmatprep.subr.mxu1 %v677_v0  ;;  %277 = vmatprep.subr.mxu0 %v248_v7  ;;  %v335_v17 = vld [vmem:[#allocation4 + $0x10] sm:$0xff]  ;;  %v241_v18 = vld [vmem:[#allocation2 + $0x20] sm:$0xff]  ;;  %v240_v19 = vld [vmem:[#allocation2 + $0x18] sm:$0xff] }
  0x32   : > { %554 = vmatpush3.msra.mxu1 %v338_v8  ;;  %278 = vmatpush1.msra.mxu0 %v247_v9  ;;  %v334_v20 = vld [vmem:[#allocation4 + $0x8] sm:$0xff]  ;;  %v239_v21 = vld [vmem:[#allocation2 + $0x10] sm:$0xff]  ;;  %v333_v23 = vld [vmem:[#allocation4] sm:$0xff] }
  0x33   : > { %555 = vmatprep.subr.mxu1 %v677_v0  ;;  %279 = vmatprep.subr.mxu0 %v246_v10  ;;  %v238_v22 = vld [vmem:[#allocation2 + $0x8] sm:$0xff]  ;;  %v237_v24 = vld [vmem:[#allocation2] sm:$0xff] }
  0x34   : > { %556 = vmatpush3.msra.mxu1 %v337_v11  ;;  %280 = vmatpush1.msra.mxu0 %v245_v12  ;;  %v236_v25 = vld [vmem:[%s226_s10] sm:$0x7] }
  0x35   : > { %557 = vmatprep.subr.mxu1 %v677_v0  ;;  %281 = vmatprep.subr.mxu0 %v244_v13 }
  0x36   : > { %558 = vmatpush3.msra.mxu1 %v336_v14  ;;  %282 = vmatpush1.msra.mxu0 %v243_v15 }
  0x37   : > { %559 = vmatprep.subr.mxu1 %v677_v0  ;;  %283 = vmatprep.subr.mxu0 %v242_v16 }
  0x38   : > { %560 = vmatpush3.msra.mxu1 %v335_v17  ;;  %284 = vmatpush1.msra.mxu0 %v241_v18 }
  0x39   : > { %561 = vmatprep.subr.mxu1 %v677_v0  ;;  %285 = vmatprep.subr.mxu0 %v240_v19 }
  0x3a   : > { %562 = vmatpush3.msra.mxu1 %v334_v20  ;;  %286 = vmatpush1.msra.mxu0 %v239_v21 }
  0x3b   : > { %563 = vmatprep.subr.mxu1 %v677_v0  ;;  %287 = vmatprep.subr.mxu0 %v238_v22 }
  0x3c   : > { %564 = vmatpush3.msra.mxu1 %v333_v23  ;;  %288 = vmatpush1.msra.mxu0 %v237_v24 }
  0x3d   : > { %566 = vmatmul.mubr.msk.f32.vlgmr.msra.gmra.mxu1 %vm253_vm1, %v236_v25  ;;  %535 = vmatmul.mubr.msk.f32.vlgmr.msra.gmra.mxu0 %vm253_vm1, %v236_v25 }
  0xfd   : > { %v407_v26 = vpop.f32.mrf.mxu1  ;;  %v323_v27 = vpop.f32.mrf.mxu0 }
  0xfe   : > { %v411_v28 = vand.u32 2147483647, %v407_v26 }
  0xff   : > { %v567_v29 = vpop.f32.mrf.mxu1  ;;  %v325_v30 = vpop.f32.mrf.mxu0 }
 0x100   : > { %413 = vst.msk [vmem:[%s235_s13] sm:$0x7] %vm412_vm2, %v411_v28  ;;  %v330_v31 = vcombine.low %v323_v27, %v325_v30 }
 0x102   : > { %332 = vst [vmem:[%s231_s19] sm:$0x77] %v330_v31 }
 0x103 PF: > { %s17_s15 = sadd.s32 1, %s669_s15  }
 0x104   : > { %p14_p2 = scmp.ge.s32.totalorder %s17_s15, 4  }
 0x106   :  { %16 = sbr.rel (!%p14_p2) target bundleno = 2 (0x2), region = 83 }
 0x10b   :  { %449 = vsyncpa [#allocation3], 1 }
 0x10c   :  { %451 = vsyncpa [#allocation3 + $0x1], 1 }
 0x10d   :  { %452 = vsyncpa [#allocation5], 1 }

</bundles_post_ra>
